<compile_context>
chip_gen: v6e
topology: v6e:2x2x1
jax: 0.10.0
libtpu: 0.0.40
codegen_flags: <defaults>
</compile_context>

<pallas_src>
import jax
import jax.numpy as jnp
from jax.experimental import pallas as pl
from jax.experimental.pallas import tpu as pltpu


_MAX_DMA_CHUNKS = 8          # max concurrent HBM->HBM DMAs
_MIN_CHUNK_BYTES = 1 << 20   # only split when each chunk is >= ~1 MiB


def _make_identity_kernel(n_chunks: int, chunk_rows: int, rows: int):
    """Kernel that copies `rows` rows from x_hbm to o_hbm via n_chunks DMAs."""

    def kernel(x_hbm, o_hbm, sem):
        copies = []
        # Issue all DMAs first (they run concurrently), then wait on all.
        for i in range(n_chunks):
            start = i * chunk_rows
            size = min(chunk_rows, rows - start)
            cp = pltpu.make_async_copy(
                x_hbm.at[pl.ds(start, size)],
                o_hbm.at[pl.ds(start, size)],
                sem.at[i],
            )
            cp.start()
            copies.append(cp)
        for cp in copies:
            cp.wait()

    return kernel


def diffusion_forward(x: jax.Array) -> jax.Array:
    """Identity forward pass of `Diffusion`, executed through a Pallas kernel."""
    orig_shape = x.shape

    # Flatten to 2D with a wide, lane-dense trailing axis:
    #   NCHW -> (N*C, H*W). Generic ndim handled below (glue reshapes are
    #   metadata-only / cheap and stay in plain JAX).
    if x.ndim == 0:
        x2 = x.reshape(1, 1)
    elif x.ndim == 1:
        x2 = x.reshape(1, x.shape[0])
    elif x.ndim == 2:
        x2 = x
    else:
        x2 = x.reshape(-1, x.shape[-2] * x.shape[-1])

    rows, cols = x2.shape
    total_bytes = rows * cols * jnp.dtype(x2.dtype).itemsize

    # Split big arrays into a few contiguous row chunks (concurrent DMAs);
    # small arrays use a single DMA.
    n_chunks = max(1, min(_MAX_DMA_CHUNKS, rows, total_bytes // _MIN_CHUNK_BYTES))
    chunk_rows = pl.cdiv(rows, n_chunks)
    n_chunks = pl.cdiv(rows, chunk_rows)

    out = pl.pallas_call(
        _make_identity_kernel(n_chunks, chunk_rows, rows),
        out_shape=jax.ShapeDtypeStruct((rows, cols), x2.dtype),
        in_specs=[pl.BlockSpec(memory_space=pl.ANY)],
        out_specs=pl.BlockSpec(memory_space=pl.ANY),
        scratch_shapes=[pltpu.SemaphoreType.DMA((n_chunks,))],
    )(x2)

    return out.reshape(orig_shape)


if __name__ == "__main__":
    # Deterministic example input matching a typical NCHW diffusion input:
    # batch=2, channels=4, spatial=16x16.
    key = jax.random.PRNGKey(0)
    x = jax.random.normal(key, (2, 4, 16, 16), dtype=jnp.float32)

    fwd = jax.jit(diffusion_forward)
    y = jax.block_until_ready(fwd(x))

    assert y.shape == x.shape and y.dtype == x.dtype
    assert jnp.array_equal(y, x), "identity forward mismatch"

    print("KERNEL_OK")
</pallas_src>

<mosaic_0001>
module attributes {stable_mosaic.version = 11 : i64} {
  func.func @kernel(%arg0: memref<8x256xf32, #tpu.memory_space<any>>, %arg1: memref<8x256xf32, #tpu.memory_space<any>>, %arg2: memref<1x!tpu.dma_semaphore, #tpu.memory_space<semaphore_mem>>) attributes {dimension_semantics = [], scalar_prefetch = 0 : i64, scratch_operands = 1 : i64, tpu.core_type = #tpu.core_type<tc>} {
    %c0_i32 = arith.constant 0 : i32
    %c0_i32_0 = arith.constant 0 : i32
    %c0_i32_1 = arith.constant 0 : i32
    %0 = tpu.memref_slice %arg0[%c0_i32_0, %c0_i32_1] : memref<8x256xf32, #tpu.memory_space<any>> -> memref<8x256xf32, #tpu.memory_space<any>>
    %c0_i32_2 = arith.constant 0 : i32
    %c0_i32_3 = arith.constant 0 : i32
    %1 = tpu.memref_slice %arg1[%c0_i32_2, %c0_i32_3] : memref<8x256xf32, #tpu.memory_space<any>> -> memref<8x256xf32, #tpu.memory_space<any>>
    %2 = tpu.memref_slice %arg2[%c0_i32] : memref<1x!tpu.dma_semaphore, #tpu.memory_space<semaphore_mem>> -> memref<1x!tpu.dma_semaphore, #tpu.memory_space<semaphore_mem>>
    %3 = tpu.memref_squeeze %2 : memref<1x!tpu.dma_semaphore, #tpu.memory_space<semaphore_mem>> -> memref<!tpu.dma_semaphore, #tpu.memory_space<semaphore_mem>>
    tpu.enqueue_dma source(%0 : memref<8x256xf32, #tpu.memory_space<any>>) target(%1 : memref<8x256xf32, #tpu.memory_space<any>>) target_semaphore(%3 : memref<!tpu.dma_semaphore, #tpu.memory_space<semaphore_mem>>)
    %c0_i32_4 = arith.constant 0 : i32
    %c0_i32_5 = arith.constant 0 : i32
    %c0_i32_6 = arith.constant 0 : i32
    %4 = tpu.memref_slice %arg0[%c0_i32_5, %c0_i32_6] : memref<8x256xf32, #tpu.memory_space<any>> -> memref<8x256xf32, #tpu.memory_space<any>>
    %c0_i32_7 = arith.constant 0 : i32
    %c0_i32_8 = arith.constant 0 : i32
    %5 = tpu.memref_slice %arg1[%c0_i32_7, %c0_i32_8] : memref<8x256xf32, #tpu.memory_space<any>> -> memref<8x256xf32, #tpu.memory_space<any>>
    %6 = tpu.memref_slice %arg2[%c0_i32_4] : memref<1x!tpu.dma_semaphore, #tpu.memory_space<semaphore_mem>> -> memref<1x!tpu.dma_semaphore, #tpu.memory_space<semaphore_mem>>
    %7 = tpu.memref_squeeze %6 : memref<1x!tpu.dma_semaphore, #tpu.memory_space<semaphore_mem>> -> memref<!tpu.dma_semaphore, #tpu.memory_space<semaphore_mem>>
    tpu.wait_dma2 semaphore(%7 : memref<!tpu.dma_semaphore, #tpu.memory_space<semaphore_mem>>) src(%4 : memref<8x256xf32, #tpu.memory_space<any>>) dst(%5 : memref<8x256xf32, #tpu.memory_space<any>>)
    return
  }
}

</mosaic_0001>

<bundles_post_ra>
// kernel: diffusion_forward.1
= control target key start
LH: loop header
LB: loop body
LE: loop exit
PB: predicated region body
PF: predicated region fallthrough
CT: control target
= control target key end

     0   :  { %s94_s0 = inlined_call_operand.vmem [shape: f32[8,256], index: 0, kind: input, shape index: {}]   ;;  %s95_s1 = inlined_call_operand.vmem [shape: f32[8,256], index: 1, kind: output, shape index: {}]  }
   0x1   :  { %v39_v0 = vld [vmem:[%s94_s0] sm:$0xff]  ;;  %v41_v1 = vld [vmem:[%s94_s0 + $0x8] sm:$0xff] }
   0x2   :  { %40 = vst [vmem:[%s95_s1] sm:$0xff] %v39_v0  ;;  %42 = vst [vmem:[%s95_s1 + $0x8] sm:$0xff] %v41_v1 }
   0x3   :  { %50 = vsyncadd [#allocation2], 256 }
   0x4   :  { %70 = dma.done.wait [#allocation2], 256 }
   0x5   :  { %71 = vsyncadd [#allocation2], 4294967040 }
   0x6   :  { %55 = vsyncmov [#allocation2] }
   0x9   :  { %s56_s14 = vpop.sfrf %55 }
   0xa   :  { %p69_p0 = scmp.ne.s32.totalorder %s56_s14, 0 }
   0xc   :  { %60 = shalt.err (%p69_p0)  }

</bundles_post_ra>
